<compile_context>
chip_gen: v5e
topology: v5e:2x2
jax: 0.10.0
libtpu: 0.0.40
codegen_flags: <defaults>
</compile_context>

<pallas_src>
import jax
import jax.numpy as jnp
import numpy as np
from jax.experimental import pallas as pl
from jax.experimental.pallas import tpu as pltpu

EPS = 1e-5

# dtype of the matmul *inputs* at the MXU boundary.  f32 keeps exact parity
# with the f32 PyTorch module; set jnp.bfloat16 on v6e/v7x for ~2x MXU
# throughput and half the tap footprint (accumulation stays f32 either way).
MXU_DTYPE = jnp.float32


def _conv3(v, w_ref, is_first, is_last):
    """k=3, padding=1 Conv1d over rows-of-sequences v: (B*L, Cin) -> (B*L, Cout).

    Three stationary-weight MXU matmuls over rolled copies of v, accumulated in
    f32.  pltpu.roll is circular; rows whose tap would cross a sequence (=
    batch) boundary are zeroed via the iota masks -- exactly the conv padding.
    """
    m = v.shape[0]
    left = jnp.where(is_first, 0.0, pltpu.roll(v, 1, axis=0))       # v[l-1]
    right = jnp.where(is_last, 0.0, pltpu.roll(v, m - 1, axis=0))   # v[l+1]
    acc = jnp.dot(left.astype(MXU_DTYPE), w_ref[0].astype(MXU_DTYPE),
                  preferred_element_type=jnp.float32)
    acc = acc + jnp.dot(v.astype(MXU_DTYPE), w_ref[1].astype(MXU_DTYPE),
                        preferred_element_type=jnp.float32)
    acc = acc + jnp.dot(right.astype(MXU_DTYPE), w_ref[2].astype(MXU_DTYPE),
                        preferred_element_type=jnp.float32)
    return acc


def _bn_relu(v, g_ref, be_ref, inv_n):
    """Training-mode BatchNorm1d + ReLU over rows (= N*L per channel).

    Centered (two-pass) variance for numerical robustness, then one fused
    scale/shift pass.
    """
    mean = jnp.sum(v, axis=0, keepdims=True) * inv_n          # (1, Cout)
    c = v - mean
    var = jnp.sum(c * c, axis=0, keepdims=True) * inv_n       # biased variance
    scale = jax.lax.rsqrt(var + EPS) * g_ref[...]
    return jnp.maximum(c * scale + be_ref[...], 0.0)


def encoder_block_kernel(x_ref, w1_ref, g1_ref, be1_ref, w2_ref, g2_ref,
                         be2_ref, pool_ref, full_ref, s3_ref):
    # x_ref   : (B, Cin, L)      NCL, same layout as PyTorch
    # w1_ref  : (3, Cin, Cout)   w1_ref[k][c, o] = torch_w1[o, c, k]
    # w2_ref  : (3, Cout, Cout)
    # g*/be*  : (1, Cout)        BatchNorm affine parameters
    # pool_ref: (B, Cout, L//2)  full_ref: (B, Cout, L)
    # s3_ref  : VMEM scratch (B*L, Cout) for the stride-2 pooling read
    B, Cin, L = x_ref.shape
    Cout = full_ref.shape[1]
    Lpool = pool_ref.shape[2]
    M = B * L
    inv_n = 1.0 / M

    # NCL -> (rows = batch*length, lanes = channels): one minor-dim transpose
    # (XLU) and a layout-trivial major-dim merge (L is a multiple of 8).
    x = jnp.transpose(x_ref[...], (0, 2, 1)).reshape(M, Cin)

    # Position of every row inside its own sequence.  Rows at position 0 / L-1
    # have their out-of-sequence taps zeroed (= conv / pool zero padding),
    # which also stops taps leaking between batch elements after flattening.
    pos = jax.lax.broadcasted_iota(jnp.int32, (B, L, 1), 1).reshape(M, 1)
    is_first = pos == 0
    is_last = pos == (L - 1)

    # conv1 -> BN1 -> ReLU -> conv2 -> BN2 -> ReLU.
    # Conv biases are dropped: they cancel exactly inside training-mode BN.
    a = _bn_relu(_conv3(x, w1_ref, is_first, is_last), g1_ref, be1_ref, inv_n)
    z = _bn_relu(_conv3(a, w2_ref, is_first, is_last), g2_ref, be2_ref, inv_n)

    # x_in output, back to NCL (minor-dim transpose only).
    full_ref[...] = jnp.transpose(z.reshape(B, L, Cout), (0, 2, 1))

    # AvgPool1d(kernel=3, stride=2, padding=1), count_include_pad=True:
    #   pooled[l] = (z[2l-1] + z[2l] + z[2l+1]) / 3 = s3[2l]
    # s3 is an O(L) rolled 3-tap mean; even rows are then picked with a
    # sublane stride-2 read -- no (L, Lpool) selection-matrix matmul.
    z_left = jnp.where(is_first, 0.0, pltpu.roll(z, 1, axis=0))
    z_right = jnp.where(is_last, 0.0, pltpu.roll(z, M - 1, axis=0))
    s3_ref[...] = (z_left + z + z_right) * (1.0 / 3.0)
    p = s3_ref[pl.ds(0, B * Lpool, 2), :]                     # rows 0, 2, 4, ...
    pool_ref[...] = jnp.transpose(p.reshape(B, Lpool, Cout), (0, 2, 1))


@jax.jit
def encoder_block_forward(x, params):
    """x: (B, Cin, L) float32, PyTorch NCL.  Returns (pooled, x_in), both NCL,
    matching EncoderBlock.forward with training-mode BatchNorm."""
    w1, b1, g1, be1, w2, b2, g2, be2 = params
    del b1, b2   # conv biases cancel exactly under training-mode BatchNorm
    B, Cin, L = x.shape
    Cout, _, K = w1.shape
    assert K == 3, "kernel is specialized to kernel_size=3, padding=1"
    # L multiple of 16 keeps every in-kernel reshape layout-trivial (sublane
    # tile is 8 and Lpool = L // 2) and makes the stride-2 pooling read exact.
    assert L % 16 == 0, "pad the sequence length to a multiple of 16"
    Lpool = (L + 2 - 3) // 2 + 1        # == L // 2 for even L

    # Tiny parameter re-layout only: w_t[k] is the (C, Cout) matrix that
    # right-multiplies the rows-of-sequences activation for tap k.
    w1_t = jnp.transpose(w1, (2, 1, 0))        # (3, Cin, Cout)
    w2_t = jnp.transpose(w2, (2, 1, 0))        # (3, Cout, Cout)

    # Single fused invocation: whole block must fit in VMEM (covers e.g.
    # B=8, C=64, L=4096 within ~24 MiB -- safe on v5e/v6e/v7x).
    # TODO(synk): for larger shapes, tile over batch/length with a two-pass
    # BatchNorm (stats pass + normalize pass) so the x/full/pooled DMAs
    # double-buffer with compute, and mark the batch axis "parallel" for
    # v7x's two TensorCores.
    workset = 4 * (B * Cin * L + 7 * B * Cout * L + B * Cout * Lpool)
    assert workset < 24 * 1024 * 1024, (
        "shapes too large for the single-invocation kernel; tile the grid")

    M = B * L
    flops = 2 * M * 3 * Cin * Cout + 2 * M * 3 * Cout * Cout + 12 * M * Cout
    bytes_accessed = 4 * (B * Cin * L + 2 * B * Cout * L + B * Cout * Lpool
                          + 3 * Cin * Cout + 3 * Cout * Cout + 4 * Cout)

    vmem = pl.BlockSpec(memory_space=pltpu.MemorySpace.VMEM)
    pooled, full = pl.pallas_call(
        encoder_block_kernel,
        out_shape=(jax.ShapeDtypeStruct((B, Cout, Lpool), jnp.float32),
                   jax.ShapeDtypeStruct((B, Cout, L), jnp.float32)),
        in_specs=[vmem] * 7,
        out_specs=(vmem, vmem),
        scratch_shapes=[pltpu.VMEM((M, Cout), jnp.float32)],
        compiler_params=pltpu.CompilerParams(
            vmem_limit_bytes=48 * 1024 * 1024),
        cost_estimate=pl.CostEstimate(flops=flops, transcendentals=0,
                                      bytes_accessed=bytes_accessed),
    )(x, w1_t,
      g1.reshape(1, Cout), be1.reshape(1, Cout),
      w2_t,
      g2.reshape(1, Cout), be2.reshape(1, Cout))
    return pooled, full


def reference_forward(x, params):
    """Pure-JAX reference (training-mode BN), NCL layout throughout."""
    w1, b1, g1, be1, w2, b2, g2, be2 = params

    def conv1d(v, w, b):
        out = jax.lax.conv_general_dilated(
            v, w, window_strides=(1,), padding=((1, 1),),
            dimension_numbers=("NCH", "OIH", "NCH"))
        return out + b[None, :, None]

    def bn(v, g, be):
        mean = jnp.mean(v, axis=(0, 2), keepdims=True)
        var = jnp.mean((v - mean) ** 2, axis=(0, 2), keepdims=True)
        return (v - mean) / jnp.sqrt(var + EPS) * g[None, :, None] + be[None, :, None]

    a = jax.nn.relu(bn(conv1d(x, w1, b1), g1, be1))
    z = jax.nn.relu(bn(conv1d(a, w2, b2), g2, be2))
    zp = jnp.pad(z, ((0, 0), (0, 0), (1, 1)))
    Lpool = (z.shape[2] + 2 - 3) // 2 + 1
    pooled = jnp.stack(
        [(zp[:, :, 2 * l] + zp[:, :, 2 * l + 1] + zp[:, :, 2 * l + 2]) / 3.0
         for l in range(Lpool)], axis=2)
    return pooled, z


if __name__ == "__main__":
    B, Cin, Cout, L, K = 2, 4, 8, 16, 3

    key = jax.random.PRNGKey(0)
    ks = jax.random.split(key, 9)
    # deterministic synthetic parameters (shapes per nn.Conv1d / nn.BatchNorm1d)
    w1 = 0.2 * jax.random.normal(ks[0], (Cout, Cin, K), jnp.float32)
    b1 = 0.1 * jax.random.normal(ks[1], (Cout,), jnp.float32)
    g1 = 1.0 + 0.1 * jax.random.normal(ks[2], (Cout,), jnp.float32)
    be1 = 0.1 * jax.random.normal(ks[3], (Cout,), jnp.float32)
    w2 = 0.2 * jax.random.normal(ks[4], (Cout, Cout, K), jnp.float32)
    b2 = 0.1 * jax.random.normal(ks[5], (Cout,), jnp.float32)
    g2 = 1.0 + 0.1 * jax.random.normal(ks[6], (Cout,), jnp.float32)
    be2 = 0.1 * jax.random.normal(ks[7], (Cout,), jnp.float32)
    params = (w1, b1, g1, be1, w2, b2, g2, be2)

    x = jax.random.normal(ks[8], (B, Cin, L), jnp.float32)

    pooled, full = encoder_block_forward(x, params)
    pooled = jax.block_until_ready(pooled)
    full = jax.block_until_ready(full)

    ref_pooled, ref_full = reference_forward(x, params)
    np.testing.assert_allclose(np.asarray(full), np.asarray(ref_full),
                               rtol=1e-4, atol=1e-4)
    np.testing.assert_allclose(np.asarray(pooled), np.asarray(ref_pooled),
                               rtol=1e-4, atol=1e-4)

    assert pooled.shape == (B, Cout, L // 2) and full.shape == (B, Cout, L)
    print("KERNEL_OK")
</pallas_src>

<mosaic_0001>
module attributes {stable_mosaic.version = 11 : i64} {
  func.func @encoder_block_kernel(%arg0: memref<2x4x16xf32, #tpu.memory_space<vmem>>, %arg1: memref<3x4x8xf32, #tpu.memory_space<vmem>>, %arg2: memref<1x8xf32, #tpu.memory_space<vmem>>, %arg3: memref<1x8xf32, #tpu.memory_space<vmem>>, %arg4: memref<3x8x8xf32, #tpu.memory_space<vmem>>, %arg5: memref<1x8xf32, #tpu.memory_space<vmem>>, %arg6: memref<1x8xf32, #tpu.memory_space<vmem>>, %arg7: memref<2x8x8xf32, #tpu.memory_space<vmem>>, %arg8: memref<2x8x16xf32, #tpu.memory_space<vmem>>, %arg9: memref<32x8xf32, #tpu.memory_space<vmem>>) attributes {dimension_semantics = [], scalar_prefetch = 0 : i64, scratch_operands = 1 : i64, tpu.core_type = #tpu.core_type<tc>} {
    %c0 = arith.constant 0 : index
    %c0_0 = arith.constant 0 : index
    %c0_1 = arith.constant 0 : index
    %0 = vector.load %arg0[%c0, %c0_0, %c0_1] : memref<2x4x16xf32, #tpu.memory_space<vmem>>, vector<2x4x16xf32>
    %1 = tpu.transpose %0, [0, 2, 1] : vector<2x4x16xf32> -> vector<2x16x4xf32>
    %2 = vector.shape_cast %1 : vector<2x16x4xf32> to vector<32x4xf32>
    %3 = tpu.iota {dimensions = array<i32: 1>} : vector<2x16x1xi32>
    %4 = vector.shape_cast %3 : vector<2x16x1xi32> to vector<32x1xi32>
    %c0_i32 = arith.constant 0 : i32
    %5 = vector.broadcast %c0_i32 : i32 to vector<32x1xi32>
    %6 = arith.cmpi eq, %4, %5 : vector<32x1xi32>
    %c15_i32 = arith.constant 15 : i32
    %7 = vector.broadcast %c15_i32 : i32 to vector<32x1xi32>
    %8 = arith.cmpi eq, %4, %7 : vector<32x1xi32>
    %c1_i32 = arith.constant 1 : i32
    %9 = tpu.dynamic_rotate %2 by %c1_i32 dim 0 : vector<32x4xf32>, i32 -> vector<32x4xf32>
    %cst = arith.constant 0.000000e+00 : f32
    %10 = vector.shape_cast %6 : vector<32x1xi1> to vector<32x1xi1>
    %11 = vector.broadcast %10 : vector<32x1xi1> to vector<32x4xi1>
    %12 = vector.broadcast %cst : f32 to vector<32x4xf32>
    %13 = arith.select %11, %12, %9 : vector<32x4xi1>, vector<32x4xf32>
    %c31_i32 = arith.constant 31 : i32
    %14 = tpu.dynamic_rotate %2 by %c31_i32 dim 0 : vector<32x4xf32>, i32 -> vector<32x4xf32>
    %cst_2 = arith.constant 0.000000e+00 : f32
    %15 = vector.shape_cast %8 : vector<32x1xi1> to vector<32x1xi1>
    %16 = vector.broadcast %15 : vector<32x1xi1> to vector<32x4xi1>
    %17 = vector.broadcast %cst_2 : f32 to vector<32x4xf32>
    %18 = arith.select %16, %17, %14 : vector<32x4xi1>, vector<32x4xf32>
    %c0_3 = arith.constant 0 : index
    %c0_4 = arith.constant 0 : index
    %c0_5 = arith.constant 0 : index
    %19 = vector.load %arg1[%c0_3, %c0_4, %c0_5] : memref<3x4x8xf32, #tpu.memory_space<vmem>>, vector<1x4x8xf32>
    %20 = vector.shape_cast %19 : vector<1x4x8xf32> to vector<4x8xf32>
    %cst_6 = arith.constant dense<0.000000e+00> : vector<32x8xf32>
    %21 = tpu.matmul %13, %20, %cst_6 {dimension_numbers = #tpu.dot_dimension_numbers<[1], [0], [0], [1], [0, 0, 1, 1], [], []>} : vector<32x4xf32>, vector<4x8xf32>, vector<32x8xf32> -> vector<32x8xf32>
    %c1 = arith.constant 1 : index
    %c0_7 = arith.constant 0 : index
    %c0_8 = arith.constant 0 : index
    %22 = vector.load %arg1[%c1, %c0_7, %c0_8] : memref<3x4x8xf32, #tpu.memory_space<vmem>>, vector<1x4x8xf32>
    %23 = vector.shape_cast %22 : vector<1x4x8xf32> to vector<4x8xf32>
    %cst_9 = arith.constant dense<0.000000e+00> : vector<32x8xf32>
    %24 = tpu.matmul %2, %23, %cst_9 {dimension_numbers = #tpu.dot_dimension_numbers<[1], [0], [0], [1], [0, 0, 1, 1], [], []>} : vector<32x4xf32>, vector<4x8xf32>, vector<32x8xf32> -> vector<32x8xf32>
    %25 = arith.addf %21, %24 : vector<32x8xf32>
    %c2 = arith.constant 2 : index
    %c0_10 = arith.constant 0 : index
    %c0_11 = arith.constant 0 : index
    %26 = vector.load %arg1[%c2, %c0_10, %c0_11] : memref<3x4x8xf32, #tpu.memory_space<vmem>>, vector<1x4x8xf32>
    %27 = vector.shape_cast %26 : vector<1x4x8xf32> to vector<4x8xf32>
    %cst_12 = arith.constant dense<0.000000e+00> : vector<32x8xf32>
    %28 = tpu.matmul %18, %27, %cst_12 {dimension_numbers = #tpu.dot_dimension_numbers<[1], [0], [0], [1], [0, 0, 1, 1], [], []>} : vector<32x4xf32>, vector<4x8xf32>, vector<32x8xf32> -> vector<32x8xf32>
    %29 = arith.addf %25, %28 : vector<32x8xf32>
    %cst_13 = arith.constant dense<0.000000e+00> : vector<8xf32>
    %30 = vector.multi_reduction <add>, %29, %cst_13 [0] : vector<32x8xf32> to vector<8xf32>
    %31 = vector.shape_cast %30 : vector<8xf32> to vector<1x8xf32>
    %cst_14 = arith.constant 3.125000e-02 : f32
    %32 = vector.broadcast %cst_14 : f32 to vector<1x8xf32>
    %33 = arith.mulf %31, %32 : vector<1x8xf32>
    %34 = vector.broadcast %33 : vector<1x8xf32> to vector<32x8xf32>
    %35 = arith.subf %29, %34 : vector<32x8xf32>
    %36 = arith.mulf %35, %35 : vector<32x8xf32>
    %cst_15 = arith.constant dense<0.000000e+00> : vector<8xf32>
    %37 = vector.multi_reduction <add>, %36, %cst_15 [0] : vector<32x8xf32> to vector<8xf32>
    %38 = vector.shape_cast %37 : vector<8xf32> to vector<1x8xf32>
    %cst_16 = arith.constant 3.125000e-02 : f32
    %39 = vector.broadcast %cst_16 : f32 to vector<1x8xf32>
    %40 = arith.mulf %38, %39 : vector<1x8xf32>
    %cst_17 = arith.constant 9.99999974E-6 : f32
    %41 = vector.broadcast %cst_17 : f32 to vector<1x8xf32>
    %42 = arith.addf %40, %41 : vector<1x8xf32>
    %43 = math.rsqrt %42 : vector<1x8xf32>
    %c0_18 = arith.constant 0 : index
    %c0_19 = arith.constant 0 : index
    %44 = vector.load %arg2[%c0_18, %c0_19] : memref<1x8xf32, #tpu.memory_space<vmem>>, vector<1x8xf32>
    %45 = arith.mulf %43, %44 : vector<1x8xf32>
    %46 = vector.broadcast %45 : vector<1x8xf32> to vector<32x8xf32>
    %47 = arith.mulf %35, %46 : vector<32x8xf32>
    %c0_20 = arith.constant 0 : index
    %c0_21 = arith.constant 0 : index
    %48 = vector.load %arg3[%c0_20, %c0_21] : memref<1x8xf32, #tpu.memory_space<vmem>>, vector<1x8xf32>
    %49 = vector.broadcast %48 : vector<1x8xf32> to vector<32x8xf32>
    %50 = arith.addf %47, %49 : vector<32x8xf32>
    %cst_22 = arith.constant 0.000000e+00 : f32
    %51 = vector.broadcast %cst_22 : f32 to vector<32x8xf32>
    %52 = arith.maximumf %50, %51 : vector<32x8xf32>
    %c1_i32_23 = arith.constant 1 : i32
    %53 = tpu.dynamic_rotate %52 by %c1_i32_23 dim 0 : vector<32x8xf32>, i32 -> vector<32x8xf32>
    %cst_24 = arith.constant 0.000000e+00 : f32
    %54 = vector.shape_cast %6 : vector<32x1xi1> to vector<32x1xi1>
    %55 = vector.broadcast %54 : vector<32x1xi1> to vector<32x8xi1>
    %56 = vector.broadcast %cst_24 : f32 to vector<32x8xf32>
    %57 = arith.select %55, %56, %53 : vector<32x8xi1>, vector<32x8xf32>
    %c31_i32_25 = arith.constant 31 : i32
    %58 = tpu.dynamic_rotate %52 by %c31_i32_25 dim 0 : vector<32x8xf32>, i32 -> vector<32x8xf32>
    %cst_26 = arith.constant 0.000000e+00 : f32
    %59 = vector.shape_cast %8 : vector<32x1xi1> to vector<32x1xi1>
    %60 = vector.broadcast %59 : vector<32x1xi1> to vector<32x8xi1>
    %61 = vector.broadcast %cst_26 : f32 to vector<32x8xf32>
    %62 = arith.select %60, %61, %58 : vector<32x8xi1>, vector<32x8xf32>
    %c0_27 = arith.constant 0 : index
    %c0_28 = arith.constant 0 : index
    %c0_29 = arith.constant 0 : index
    %63 = vector.load %arg4[%c0_27, %c0_28, %c0_29] : memref<3x8x8xf32, #tpu.memory_space<vmem>>, vector<1x8x8xf32>
    %64 = vector.shape_cast %63 : vector<1x8x8xf32> to vector<8x8xf32>
    %cst_30 = arith.constant dense<0.000000e+00> : vector<32x8xf32>
    %65 = tpu.matmul %57, %64, %cst_30 {dimension_numbers = #tpu.dot_dimension_numbers<[1], [0], [0], [1], [0, 0, 1, 1], [], []>} : vector<32x8xf32>, vector<8x8xf32>, vector<32x8xf32> -> vector<32x8xf32>
    %c1_31 = arith.constant 1 : index
    %c0_32 = arith.constant 0 : index
    %c0_33 = arith.constant 0 : index
    %66 = vector.load %arg4[%c1_31, %c0_32, %c0_33] : memref<3x8x8xf32, #tpu.memory_space<vmem>>, vector<1x8x8xf32>
    %67 = vector.shape_cast %66 : vector<1x8x8xf32> to vector<8x8xf32>
    %cst_34 = arith.constant dense<0.000000e+00> : vector<32x8xf32>
    %68 = tpu.matmul %52, %67, %cst_34 {dimension_numbers = #tpu.dot_dimension_numbers<[1], [0], [0], [1], [0, 0, 1, 1], [], []>} : vector<32x8xf32>, vector<8x8xf32>, vector<32x8xf32> -> vector<32x8xf32>
    %69 = arith.addf %65, %68 : vector<32x8xf32>
    %c2_35 = arith.constant 2 : index
    %c0_36 = arith.constant 0 : index
    %c0_37 = arith.constant 0 : index
    %70 = vector.load %arg4[%c2_35, %c0_36, %c0_37] : memref<3x8x8xf32, #tpu.memory_space<vmem>>, vector<1x8x8xf32>
    %71 = vector.shape_cast %70 : vector<1x8x8xf32> to vector<8x8xf32>
    %cst_38 = arith.constant dense<0.000000e+00> : vector<32x8xf32>
    %72 = tpu.matmul %62, %71, %cst_38 {dimension_numbers = #tpu.dot_dimension_numbers<[1], [0], [0], [1], [0, 0, 1, 1], [], []>} : vector<32x8xf32>, vector<8x8xf32>, vector<32x8xf32> -> vector<32x8xf32>
    %73 = arith.addf %69, %72 : vector<32x8xf32>
    %cst_39 = arith.constant dense<0.000000e+00> : vector<8xf32>
    %74 = vector.multi_reduction <add>, %73, %cst_39 [0] : vector<32x8xf32> to vector<8xf32>
    %75 = vector.shape_cast %74 : vector<8xf32> to vector<1x8xf32>
    %cst_40 = arith.constant 3.125000e-02 : f32
    %76 = vector.broadcast %cst_40 : f32 to vector<1x8xf32>
    %77 = arith.mulf %75, %76 : vector<1x8xf32>
    %78 = vector.broadcast %77 : vector<1x8xf32> to vector<32x8xf32>
    %79 = arith.subf %73, %78 : vector<32x8xf32>
    %80 = arith.mulf %79, %79 : vector<32x8xf32>
    %cst_41 = arith.constant dense<0.000000e+00> : vector<8xf32>
    %81 = vector.multi_reduction <add>, %80, %cst_41 [0] : vector<32x8xf32> to vector<8xf32>
    %82 = vector.shape_cast %81 : vector<8xf32> to vector<1x8xf32>
    %cst_42 = arith.constant 3.125000e-02 : f32
    %83 = vector.broadcast %cst_42 : f32 to vector<1x8xf32>
    %84 = arith.mulf %82, %83 : vector<1x8xf32>
    %cst_43 = arith.constant 9.99999974E-6 : f32
    %85 = vector.broadcast %cst_43 : f32 to vector<1x8xf32>
    %86 = arith.addf %84, %85 : vector<1x8xf32>
    %87 = math.rsqrt %86 : vector<1x8xf32>
    %c0_44 = arith.constant 0 : index
    %c0_45 = arith.constant 0 : index
    %88 = vector.load %arg5[%c0_44, %c0_45] : memref<1x8xf32, #tpu.memory_space<vmem>>, vector<1x8xf32>
    %89 = arith.mulf %87, %88 : vector<1x8xf32>
    %90 = vector.broadcast %89 : vector<1x8xf32> to vector<32x8xf32>
    %91 = arith.mulf %79, %90 : vector<32x8xf32>
    %c0_46 = arith.constant 0 : index
    %c0_47 = arith.constant 0 : index
    %92 = vector.load %arg6[%c0_46, %c0_47] : memref<1x8xf32, #tpu.memory_space<vmem>>, vector<1x8xf32>
    %93 = vector.broadcast %92 : vector<1x8xf32> to vector<32x8xf32>
    %94 = arith.addf %91, %93 : vector<32x8xf32>
    %cst_48 = arith.constant 0.000000e+00 : f32
    %95 = vector.broadcast %cst_48 : f32 to vector<32x8xf32>
    %96 = arith.maximumf %94, %95 : vector<32x8xf32>
    %97 = vector.shape_cast %96 : vector<32x8xf32> to vector<2x16x8xf32>
    %98 = tpu.transpose %97, [0, 2, 1] : vector<2x16x8xf32> -> vector<2x8x16xf32>
    %c0_49 = arith.constant 0 : index
    %c0_50 = arith.constant 0 : index
    %c0_51 = arith.constant 0 : index
    %99 = vector.load %arg8[%c0_49, %c0_50, %c0_51] : memref<2x8x16xf32, #tpu.memory_space<vmem>>, vector<2x8x16xf32>
    tpu.vector_store %arg8[%c0_49, %c0_50, %c0_51], %98 {strides = array<i32>} : memref<2x8x16xf32, #tpu.memory_space<vmem>>, vector<2x8x16xf32>,
    %c1_i32_52 = arith.constant 1 : i32
    %100 = tpu.dynamic_rotate %96 by %c1_i32_52 dim 0 : vector<32x8xf32>, i32 -> vector<32x8xf32>
    %cst_53 = arith.constant 0.000000e+00 : f32
    %101 = vector.shape_cast %6 : vector<32x1xi1> to vector<32x1xi1>
    %102 = vector.broadcast %101 : vector<32x1xi1> to vector<32x8xi1>
    %103 = vector.broadcast %cst_53 : f32 to vector<32x8xf32>
    %104 = arith.select %102, %103, %100 : vector<32x8xi1>, vector<32x8xf32>
    %c31_i32_54 = arith.constant 31 : i32
    %105 = tpu.dynamic_rotate %96 by %c31_i32_54 dim 0 : vector<32x8xf32>, i32 -> vector<32x8xf32>
    %cst_55 = arith.constant 0.000000e+00 : f32
    %106 = vector.shape_cast %8 : vector<32x1xi1> to vector<32x1xi1>
    %107 = vector.broadcast %106 : vector<32x1xi1> to vector<32x8xi1>
    %108 = vector.broadcast %cst_55 : f32 to vector<32x8xf32>
    %109 = arith.select %107, %108, %105 : vector<32x8xi1>, vector<32x8xf32>
    %110 = arith.addf %104, %96 : vector<32x8xf32>
    %111 = arith.addf %110, %109 : vector<32x8xf32>
    %cst_56 = arith.constant 0.333333343 : f32
    %112 = vector.broadcast %cst_56 : f32 to vector<32x8xf32>
    %113 = arith.mulf %111, %112 : vector<32x8xf32>
    %c0_57 = arith.constant 0 : index
    %c0_58 = arith.constant 0 : index
    %114 = vector.load %arg9[%c0_57, %c0_58] : memref<32x8xf32, #tpu.memory_space<vmem>>, vector<32x8xf32>
    tpu.vector_store %arg9[%c0_57, %c0_58], %113 {strides = array<i32>} : memref<32x8xf32, #tpu.memory_space<vmem>>, vector<32x8xf32>,
    %c0_59 = arith.constant 0 : index
    %c0_60 = arith.constant 0 : index
    %115 = tpu.strided_load %arg9[%c0_59, %c0_60] {strides = array<i32: 2, 1>} : memref<32x8xf32, #tpu.memory_space<vmem>>, vector<16x8xf32>
    %116 = vector.shape_cast %115 : vector<16x8xf32> to vector<2x8x8xf32>
    %117 = tpu.transpose %116, [0, 2, 1] : vector<2x8x8xf32> -> vector<2x8x8xf32>
    %c0_61 = arith.constant 0 : index
    %c0_62 = arith.constant 0 : index
    %c0_63 = arith.constant 0 : index
    %118 = vector.load %arg7[%c0_61, %c0_62, %c0_63] : memref<2x8x8xf32, #tpu.memory_space<vmem>>, vector<2x8x8xf32>
    tpu.vector_store %arg7[%c0_61, %c0_62, %c0_63], %117 {strides = array<i32>} : memref<2x8x8xf32, #tpu.memory_space<vmem>>, vector<2x8x8xf32>,
    return
  }
}

</mosaic_0001>

<bundles_post_ra>
// kernel: encoder_block_forward.1
= control target key start
LH: loop header
LB: loop body
LE: loop exit
PB: predicated region body
PF: predicated region fallthrough
CT: control target
= control target key end

     0   :  { %14 = vsyncpa [#allocation4], 0  ;;  %vm153_vm0 = vcmask 1043456   ;;  %s1095_s0 = inlined_call_operand.vmem [shape: f32[2,4,16], index: 0, kind: input, shape index: {}]   ;;  %s1096_s1 = inlined_call_operand.vmem [shape: f32[3,4,8], index: 1, kind: input, shape index: {}]   ;;  %s1097_s2 = inlined_call_operand.vmem [shape: f32[1,8], index: 2, kind: input, shape index: {}]   ;;  %s1098_s3 = inlined_call_operand.vmem [shape: f32[1,8], index: 3, kind: input, shape index: {}]   ;;  %s1099_s4 = inlined_call_operand.vmem [shape: f32[3,8,8], index: 4, kind: input, shape index: {}]   ;;  %s1100_s5 = inlined_call_operand.vmem [shape: f32[1,8], index: 5, kind: input, shape index: {}]   ;;  %s1101_s6 = inlined_call_operand.vmem [shape: f32[1,8], index: 6, kind: input, shape index: {}]   ;;  %s1102_s7 = inlined_call_operand.hbm [shape: f32[2,8,8], index: 7, kind: output, shape index: {0}]   ;;  %s1103_s8 = inlined_call_operand.hbm [shape: f32[2,8,16], index: 8, kind: output, shape index: {1}]  }
   0x1   :  { %v31_v0 = vld [vmem:[%s1095_s0 + $0x4] sm:$0xf] }
   0x2   :  { %v781_v1 = vld [vmem:[%s1096_s1 + $0x4] sm:$0xf]  ;;  %64 = vxpose.xlu0.b32.start.end [1/1] (short) (narrow) %v31_v0, 16 }
   0x3   :  { %812 = vmatpush.msk.msra.mxu2 %vm153_vm0, %v781_v1  ;;  %782 = vmatpush.msk.msra.mxu0 %vm153_vm0, %v781_v1 }
   0x4   :  { %15 = vsyncpa [#allocation6], 0  ;;  %v30_v2 = vld [vmem:[%s1095_s0] sm:$0xf]  ;;  %v792_v3 = vld [vmem:[%s1096_s1 + $0x8] sm:$0xf]  ;;  %v96_v7 = vlaneseq }
   0x5   :  { %793 = vmatpush.msk.msrb.mxu2 %vm153_vm0, %v792_v3  ;;  %v137_v4 = vld [vmem:[%s1096_s1] sm:$0xf]  ;;  %vm140_vm1 = vcmask 31744   ;;  %vm280_vm6 = vcmask 64512   ;;  %vm633_vm13 = vcmask 130048   ;;  %s764_s26 = sshll.u32 %s1103_s8, 4  ;;  %s765_s26 = int_to_ptr.hbm [resolvable:$true] %s764_s26 }
   0x6   :  { %787 = vmatpush.msk.msra.mxu1 %vm153_vm0, %v137_v4  ;;  %813 = vmatpush.msk.msra.mxu3 %vm153_vm0, %v137_v4  ;;  %v943_v8 = vshrl.u32 %v96_v7, 7  ;;  %s878_s27 = smov 128   ;;  %s879_s28 = smov 8  }
   0x7   :  { %s880_s29 = smov [#allocation3]   ;;  %s751_s11 = sshll.u32 %s1102_s7, 4  ;;  %s752_s11 = int_to_ptr.hbm [resolvable:$true] %s751_s11 }
   0x8   :  { %vm99_vm2 = vcmp.eq.s32.totalorder %v943_v8, 0  ;;  %vm107_vm3 = vcmp.lt.s32.totalorder %v943_v8, 1  ;;  %vm124_vm4 = vcmp.lt.s32.totalorder %v943_v8, 7  ;;  %v967_v24 = vadd.s32 8, %v943_v8  ;;  %s749_s30 = sshll.u32 %s880_s29, 4  ;;  %s750_s30 = int_to_ptr.vmem [resolvable:$true] %s749_s30 }
   0xa   :  { %vm102_vm5 = vcmp.eq.s32.totalorder %v967_v24, 15 }
  0x12   :  { %32 = vxpose.xlu0.b32.start.end [1/1] (short) (narrow) %v30_v2, 16 }
  0xa6   :  { %v80_v5 = vpop.trf.xlu0 }
  0xa7   :  { %785 = vmatmul.msk.f32.vlgmr.msra.gmra.mxu2 %vm140_vm1, %v80_v5  ;;  %v105_v15 = vrot.slane %v80_v5, 7  ;;  %v122_v23 = vrot.slane %v80_v5, 1 }
  0xae   :  { %v81_v6 = vpop.trf.xlu0 }
  0xaf   :  { %786 = vmatmul.msk.f32.gmra.mxu2 %vm140_vm1, %v81_v6  ;;  %v106_v10 = vrot.slane %v81_v6, 7  ;;  %v123_v28 = vrot.slane %v81_v6, 1 }
  0xb1   :  { %v108_v27 = vsel %vm107_vm3, %v105_v15, %v106_v10  ;;  %v125_v29 = vsel %vm124_vm4, %v122_v23, %v123_v28 }
  0xb6   :  { %v48_v9 = vpop.trf.xlu0 }
  0xb7   :  { %v103_v11 = vrot.slane %v48_v9, 7  ;;  %783 = vmatmul.msk.f32.vlgmr.msra.gmra.mxu0 %vm140_vm1, %v48_v9  ;;  %v120_v16 = vrot.slane %v48_v9, 1 }
  0xb9   :  { %v111_v12 = vsel %vm107_vm3, %v106_v10, %v103_v11  ;;  %v128_v30 = vsel %vm124_vm4, %v123_v28, %v120_v16 }
  0xba   :  { %v116_v13 = vsel %vm99_vm2, 0.0, %v111_v12  ;;  %v136_v31 = vsel %vm102_vm5, 0.0, %v128_v30 }
  0xbb   :  { %788 = vmatmul.msk.f32.vlgmr.msra.gmra.mxu1 %vm140_vm1, %v116_v13 }
  0xbe   :  { %v49_v14 = vpop.trf.xlu0 }
  0xbf   :  { %v104_v17 = vrot.slane %v49_v14, 7  ;;  %v121_v18 = vrot.slane %v49_v14, 1  ;;  %784 = vmatmul.msk.f32.gmra.mxu0 %vm140_vm1, %v49_v14 }
  0xc1   :  { %v127_v19 = vsel %vm124_vm4, %v120_v16, %v121_v18  ;;  %v110_v20 = vsel %vm107_vm3, %v103_v11, %v104_v17  ;;  %v109_v21 = vsel %vm107_vm3, %v104_v17, %v105_v15  ;;  %v126_v25 = vsel %vm124_vm4, %v121_v18, %v122_v23 }
  0xc2   :  { %794 = vmatmul.msk.f32.vlgmr.msrb.gmra.mxu2 %vm140_vm1, %v127_v19  ;;  %v118_v22 = vsel %vm99_vm2, 0.0, %v109_v21  ;;  %v134_v26 = vsel %vm102_vm5, 0.0, %v126_v25  ;;  %v798_v25 = vld [vmem:[%s1099_s4 + $0x8] sm:$0xff] }
  0xc3   :  { %789 = vmatmul.msk.f32.gmra.mxu1 %vm140_vm1, %v110_v20  ;;  %790 = vmatmul.msk.f32.vlgmr.msra.gmra.mxu3 %vm140_vm1, %v118_v22 }
  0xc4   :  { %401 = vmatpush.msrb.mxu3 %v798_v25 }
  0xca   :  { %795 = vmatmul.msk.f32.gmra.mxu2 %vm140_vm1, %v134_v26  ;;  %v371_v26 = vld [vmem:[%s1099_s4] sm:$0xff] }
  0xcb   :  { %791 = vmatmul.msk.f32.gmra.mxu3 %vm140_vm1, %v108_v27  ;;  %v807_v27 = vld [vmem:[%s1099_s4 + $0x10] sm:$0xff]  ;;  %442 = vmatpush.msrb.mxu0 %v371_v26 }
  0xcc   :  { %485 = vmatpush.msrb.mxu1 %v807_v27 }
  0xd2   :  { %796 = vmatmul.msk.f32.gmra.mxu2 %vm140_vm1, %v125_v29 }
  0xda   :  { %797 = vmatmul.msk.f32.gmra.mxu2 %vm140_vm1, %v136_v31 }
 0x12a   :  { %v180_v32 = vpop.f32.mrf.mxu2 }
 0x132   :  { %v183_v33 = vpop.f32.mrf.mxu2 }
 0x134   :  { %v174_v36 = vpop.f32.mrf.mxu0 }
 0x138   :  { %v218_v35 = vpop.f32.mrf.mxu1 }
 0x139   :  { %v219_v43 = vadd.f32 %v218_v35, %v174_v36  ;;  %v328_v36 = vld [vmem:[%s1097_s2] sm:$0x1] }
 0x13c   :  { %v177_v40 = vpop.f32.mrf.mxu0 }
 0x140   :  { %v221_v39 = vpop.f32.mrf.mxu1 }
 0x141   :  { %v222_v41 = vadd.f32 %v221_v39, %v177_v40  ;;  %v819_v40 = vld [vmem:[%s1098_s3] ss:$0 sm:$0xff] }
 0x145   :  { %v264_v34 = vpop.f32.mrf.mxu2 }
 0x146   :  { %v224_v38 = vpop.f32.mrf.mxu3  ;;  %v276_v46 = vadd.f32 %v264_v34, %v219_v43 }
 0x147   :  { %v225_v44 = vadd.f32 %v224_v38, %v180_v32 }
 0x148   :  { %v281_v50 = vsel %vm280_vm6, %v276_v46, 0.0 }
 0x14d   :  { %v267_v37 = vpop.f32.mrf.mxu2 }
 0x14e   :  { %v277_v45 = vadd.f32 %v267_v37, %v222_v41  ;;  %v227_v48 = vpop.f32.mrf.mxu3 }
 0x14f   :  { %v228_v51 = vadd.f32 %v227_v48, %v183_v33 }
 0x150   :  { %v282_v49 = vsel %vm280_vm6, %v277_v45, 0.0 }
 0x151   :  { %v283_v53 = vadd.f32 %v282_v49, %v281_v50 }
 0x155   :  { %v270_v42 = vpop.f32.mrf.mxu2 }
 0x156   :  { %v278_v47 = vadd.f32 %v270_v42, %v225_v44 }
 0x158   :  { %v284_v52 = vsel %vm280_vm6, %v278_v47, 0.0 }
 0x159   :  { %v285_v56 = vadd.f32 %v284_v52, %v283_v53 }
 0x15d   :  { %v273_v54 = vpop.f32.mrf.mxu2 }
 0x15e   :  { %v279_v55 = vadd.f32 %v273_v54, %v228_v51 }
 0x160   :  { %v286_v57 = vsel %vm280_vm6, %v279_v55, 0.0 }
 0x161   :  { %v287_v58 = vadd.f32 %v286_v57, %v285_v56 }
 0x163   :  { %v288_v59 = vrot.slane %v287_v58, 4 }
 0x165   :  { %v289_v60 = vadd.f32 %v288_v59, %v287_v58 }
 0x167   :  { %v290_v61 = vrot.slane %v289_v60, 2 }
 0x169   :  { %v291_v62 = vadd.f32 %v290_v61, %v289_v60 }
 0x16b   :  { %v292_v63 = vrot.slane %v291_v62, 1 }
 0x16d   :  { %v293_v0 = vadd.f32 %v292_v63, %v291_v62 }
 0x16f   :  { %v294_v1 = vmul.f32 0.03125, %v293_v0 }
 0x171   :  { %v295_v2 = vsub.f32 %v276_v46, %v294_v1  ;;  %v296_v3 = vsub.f32 %v277_v45, %v294_v1  ;;  %v297_v4 = vsub.f32 %v278_v47, %v294_v1  ;;  %v298_v5 = vsub.f32 %v279_v55, %v294_v1 }
 0x173   :  { %v299_v6 = vmul.f32 %v295_v2, %v295_v2  ;;  %v300_v7 = vmul.f32 %v296_v3, %v296_v3  ;;  %v301_v9 = vmul.f32 %v297_v4, %v297_v4  ;;  %v302_v10 = vmul.f32 %v298_v5, %v298_v5 }
 0x175   :  { %v303_v11 = vsel %vm280_vm6, %v299_v6, 0.0  ;;  %v304_v12 = vsel %vm280_vm6, %v300_v7, 0.0  ;;  %v306_v14 = vsel %vm280_vm6, %v301_v9, 0.0  ;;  %v308_v16 = vsel %vm280_vm6, %v302_v10, 0.0 }
 0x176   :  { %v305_v13 = vadd.f32 %v304_v12, %v303_v11 }
 0x178   :  { %v307_v15 = vadd.f32 %v306_v14, %v305_v13 }
 0x17a   :  { %v309_v17 = vadd.f32 %v308_v16, %v307_v15 }
 0x17c   :  { %v310_v18 = vrot.slane %v309_v17, 4 }
 0x17e   :  { %v311_v19 = vadd.f32 %v310_v18, %v309_v17 }
 0x180   :  { %v312_v20 = vrot.slane %v311_v19, 2 }
 0x182   :  { %v313_v21 = vadd.f32 %v312_v20, %v311_v19 }
 0x184   :  { %v314_v22 = vrot.slane %v313_v21, 1 }
 0x186   :  { %v315_v23 = vadd.f32 %v314_v22, %v313_v21 }
 0x188   :  { %v316_v28 = vmul.f32 0.03125, %v315_v23 }
 0x18a   :  { %v317_v29 = vadd.f32 1e-05, %v316_v28 }
 0x18c   :  { %821 = vrsqrt.f32 %v317_v29  ;;  %vm324_vm8 = vweird.f32 %v317_v29 }
 0x192   :  { %v822_v30 = vpop.eup %821 }
 0x193   :  { %v319_v31 = vmul.f32 %v822_v30, %v317_v29  ;;  %vm325_vm7 = vweird.f32 %v822_v30 }
 0x194   :  { %vm326_vm9 = vmor %vm324_vm8, %vm325_vm7 }
 0x195   :  { %v320_v32 = vmul.f32 %v822_v30, %v319_v31 }
 0x197   :  { %v321_v33 = vmul.f32 0.5, %v320_v32 }
 0x199   :  { %v322_v34 = vsub.f32 1.5, %v321_v33 }
 0x19b   :  { %v323_v35 = vmul.f32 %v822_v30, %v322_v34 }
 0x19d   :  { %v327_v37 = vsel %vm326_vm9, %v822_v30, %v323_v35 }
 0x19e   :  { %v329_v38 = vmul.f32 %v328_v36, %v327_v37 }
 0x1a0   :  { %v330_v39 = vperm.slane %v329_v38, 0 }
 0x1a2   :  { %v334_v41 = vmul.f32 %v330_v39, %v298_v5  ;;  %v331_v42 = vmul.f32 %v330_v39, %v295_v2  ;;  %v332_v43 = vmul.f32 %v330_v39, %v296_v3  ;;  %v333_v44 = vmul.f32 %v330_v39, %v297_v4 }
 0x1a4   :  { %v342_v45 = vadd.f32 %v819_v40, %v334_v41  ;;  %v339_v46 = vadd.f32 %v819_v40, %v331_v42  ;;  %v340_v47 = vadd.f32 %v819_v40, %v332_v43  ;;  %v341_v48 = vadd.f32 %v819_v40, %v333_v44 }
 0x1a6   :  { %v346_v49 = vmax.f32 %v342_v45, 0.0  ;;  %v343_v50 = vmax.f32 %v339_v46, 0.0  ;;  %v344_v51 = vmax.f32 %v340_v47, 0.0  ;;  %v345_v52 = vmax.f32 %v341_v48, 0.0 }
 0x1a8   :  { %799 = vmatmul.msk.f32.vlgmr.msrb.gmra.mxu3 %vm280_vm6, %v343_v50  ;;  %v359_v53 = vrot.slane %v343_v50, 1  ;;  %v360_v54 = vrot.slane %v344_v51, 1  ;;  %v347_v55 = vrot.slane %v343_v50, 7  ;;  %v350_v56 = vrot.slane %v346_v49, 7 }
 0x1a9   :  { %v361_v60 = vrot.slane %v345_v52, 1  ;;  %v348_v62 = vrot.slane %v344_v51, 7  ;;  %v349_v1 = vrot.slane %v345_v52, 7  ;;  %v362_v2 = vrot.slane %v346_v49, 1 }
 0x1aa   :  { %v365_v57 = vsel %vm124_vm4, %v359_v53, %v360_v54  ;;  %v354_v58 = vsel %vm107_vm3, %v350_v56, %v347_v55 }
 0x1ab   :  { %808 = vmatmul.msk.f32.vlgmr.msrb.gmra.mxu1 %vm280_vm6, %v365_v57  ;;  %v355_v59 = vsel %vm99_vm2, 0.0, %v354_v58  ;;  %v364_v61 = vsel %vm124_vm4, %v360_v54, %v361_v60  ;;  %v353_v0 = vsel %vm107_vm3, %v347_v55, %v348_v62  ;;  %v352_v3 = vsel %vm107_vm3, %v348_v62, %v349_v1 }
 0x1ac   :  { %803 = vmatmul.msk.f32.vlgmr.msrb.gmra.mxu0 %vm280_vm6, %v355_v59  ;;  %v368_v63 = vsel %vm102_vm5, 0.0, %v364_v61  ;;  %v363_v4 = vsel %vm124_vm4, %v361_v60, %v362_v2  ;;  %v357_v5 = vsel %vm99_vm2, 0.0, %v352_v3  ;;  %v366_v6 = vsel %vm124_vm4, %v362_v2, %v359_v53 }
 0x1ad   :  { %v370_v7 = vsel %vm102_vm5, 0.0, %v366_v6  ;;  %v351_v9 = vsel %vm107_vm3, %v349_v1, %v350_v56 }
 0x1b0   :  { %800 = vmatmul.msk.f32.gmra.mxu3 %vm280_vm6, %v344_v51 }
 0x1b3   :  { %809 = vmatmul.msk.f32.gmra.mxu1 %vm280_vm6, %v368_v63 }
 0x1b4   :  { %804 = vmatmul.msk.f32.gmra.mxu0 %vm280_vm6, %v353_v0 }
 0x1b8   :  { %801 = vmatmul.msk.f32.gmra.mxu3 %vm280_vm6, %v345_v52 }
 0x1bb   :  { %810 = vmatmul.msk.f32.gmra.mxu1 %vm280_vm6, %v363_v4 }
 0x1bc   :  { %805 = vmatmul.msk.f32.gmra.mxu0 %vm280_vm6, %v357_v5 }
 0x1c0   :  { %802 = vmatmul.msk.f32.gmra.mxu3 %vm280_vm6, %v346_v49 }
 0x1c3   :  { %811 = vmatmul.msk.f32.gmra.mxu1 %vm280_vm6, %v370_v7 }
 0x1c4   :  { %806 = vmatmul.msk.f32.gmra.mxu0 %vm280_vm6, %v351_v9 }
 0x228   :  { %v487_v10 = vpop.f32.mrf.mxu1 }
 0x229   :  { %v444_v11 = vpop.f32.mrf.mxu0 }
 0x22b   :  { %v403_v12 = vpop.f32.mrf.mxu3 }
 0x22c   :  { %v445_v20 = vadd.f32 %v444_v11, %v403_v12  ;;  %v550_v11 = vld [vmem:[%s1100_s5] sm:$0x1]  ;;  %s877_s5 = smov [#allocation5]  }
 0x22e   :  { %v499_v23 = vadd.f32 %v487_v10, %v445_v20 }
 0x230   :  { %v490_v13 = vpop.f32.mrf.mxu1  ;;  %v503_v29 = vsel %vm280_vm6, %v499_v23, 0.0 }
 0x231   :  { %v447_v14 = vpop.f32.mrf.mxu0 }
 0x233   :  { %v406_v15 = vpop.f32.mrf.mxu3 }
 0x234   :  { %v448_v17 = vadd.f32 %v447_v14, %v406_v15  ;;  %v820_v15 = vld [vmem:[%s1101_s6] ss:$0 sm:$0xff]  ;;  %s762_s6 = sshll.u32 %s877_s5, 4  ;;  %s763_s6 = int_to_ptr.vmem [resolvable:$true] %s762_s6 }
 0x236   :  { %v500_v22 = vadd.f32 %v490_v13, %v448_v17 }
 0x238   :  { %v493_v18 = vpop.f32.mrf.mxu1  ;;  %v504_v26 = vsel %vm280_vm6, %v500_v22, 0.0 }
 0x239   :  { %v450_v16 = vpop.f32.mrf.mxu0  ;;  %v505_v32 = vadd.f32 %v504_v26, %v503_v29 }
 0x23b   :  { %v409_v19 = vpop.f32.mrf.mxu3 }
 0x23c   :  { %v451_v21 = vadd.f32 %v450_v16, %v409_v19 }
 0x23e   :  { %v501_v25 = vadd.f32 %v493_v18, %v451_v21 }
 0x240   :  { %v506_v30 = vsel %vm280_vm6, %v501_v25, 0.0  ;;  %v496_v33 = vpop.f32.mrf.mxu1 }
 0x241   :  { %v453_v27 = vpop.f32.mrf.mxu0  ;;  %v507_v35 = vadd.f32 %v506_v30, %v505_v32 }
 0x243   :  { %v412_v28 = vpop.f32.mrf.mxu3 }
 0x244   :  { %v454_v31 = vadd.f32 %v453_v27, %v412_v28 }
 0x246   :  { %v502_v34 = vadd.f32 %v496_v33, %v454_v31 }
 0x248   :  { %v508_v36 = vsel %vm280_vm6, %v502_v34, 0.0 }
 0x249   :  { %v509_v37 = vadd.f32 %v508_v36, %v507_v35 }
 0x24b   :  { %v510_v38 = vrot.slane %v509_v37, 4 }
 0x24d   :  { %v511_v39 = vadd.f32 %v510_v38, %v509_v37 }
 0x24f   :  { %v512_v40 = vrot.slane %v511_v39, 2 }
 0x251   :  { %v513_v41 = vadd.f32 %v512_v40, %v511_v39 }
 0x253   :  { %v514_v42 = vrot.slane %v513_v41, 1 }
 0x255   :  { %v515_v43 = vadd.f32 %v514_v42, %v513_v41 }
 0x257   :  { %v516_v44 = vmul.f32 0.03125, %v515_v43 }
 0x259   :  { %v517_v45 = vsub.f32 %v499_v23, %v516_v44  ;;  %v518_v46 = vsub.f32 %v500_v22, %v516_v44  ;;  %v519_v47 = vsub.f32 %v501_v25, %v516_v44  ;;  %v520_v48 = vsub.f32 %v502_v34, %v516_v44 }
 0x25b   :  { %v521_v49 = vmul.f32 %v517_v45, %v517_v45  ;;  %v522_v50 = vmul.f32 %v518_v46, %v518_v46  ;;  %v523_v51 = vmul.f32 %v519_v47, %v519_v47  ;;  %v524_v52 = vmul.f32 %v520_v48, %v520_v48 }
 0x25d   :  { %v525_v53 = vsel %vm280_vm6, %v521_v49, 0.0  ;;  %v526_v54 = vsel %vm280_vm6, %v522_v50, 0.0  ;;  %v528_v56 = vsel %vm280_vm6, %v523_v51, 0.0  ;;  %v530_v58 = vsel %vm280_vm6, %v524_v52, 0.0 }
 0x25e   :  { %v527_v55 = vadd.f32 %v526_v54, %v525_v53 }
 0x260   :  { %v529_v57 = vadd.f32 %v528_v56, %v527_v55 }
 0x262   :  { %v531_v59 = vadd.f32 %v530_v58, %v529_v57 }
 0x264   :  { %v532_v60 = vrot.slane %v531_v59, 4 }
 0x266   :  { %v533_v61 = vadd.f32 %v532_v60, %v531_v59 }
 0x268   :  { %v534_v62 = vrot.slane %v533_v61, 2 }
 0x26a   :  { %v535_v63 = vadd.f32 %v534_v62, %v533_v61 }
 0x26c   :  { %v536_v0 = vrot.slane %v535_v63, 1 }
 0x26e   :  { %v537_v1 = vadd.f32 %v536_v0, %v535_v63 }
 0x270   :  { %v538_v2 = vmul.f32 0.03125, %v537_v1 }
 0x272   :  { %v539_v3 = vadd.f32 1e-05, %v538_v2 }
 0x274   :  { %823 = vrsqrt.f32 %v539_v3  ;;  %vm546_vm11 = vweird.f32 %v539_v3 }
 0x27a   :  { %v824_v4 = vpop.eup %823 }
 0x27b   :  { %v541_v5 = vmul.f32 %v824_v4, %v539_v3  ;;  %vm547_vm10 = vweird.f32 %v824_v4 }
 0x27c   :  { %vm548_vm12 = vmor %vm546_vm11, %vm547_vm10 }
 0x27d   :  { %v542_v6 = vmul.f32 %v824_v4, %v541_v5 }
 0x27f   :  { %v543_v7 = vmul.f32 0.5, %v542_v6 }
 0x281   :  { %v544_v9 = vsub.f32 1.5, %v543_v7 }
 0x283   :  { %v545_v10 = vmul.f32 %v824_v4, %v544_v9 }
 0x285   :  { %v549_v12 = vsel %vm548_vm12, %v824_v4, %v545_v10 }
 0x286   :  { %v551_v13 = vmul.f32 %v550_v11, %v549_v12 }
 0x288   :  { %v552_v14 = vperm.slane %v551_v13, 0 }
 0x28a   :  { %v556_v16 = vmul.f32 %v552_v14, %v520_v48  ;;  %v555_v17 = vmul.f32 %v552_v14, %v519_v47  ;;  %v553_v18 = vmul.f32 %v552_v14, %v517_v45  ;;  %v554_v19 = vmul.f32 %v552_v14, %v518_v46 }
 0x28c   :  { %v563_v20 = vadd.f32 %v820_v15, %v555_v17  ;;  %v561_v21 = vadd.f32 %v820_v15, %v553_v18  ;;  %v564_v22 = vadd.f32 %v820_v15, %v556_v16  ;;  %v562_v23 = vadd.f32 %v820_v15, %v554_v19 }
 0x28e   :  { %v567_v25 = vmax.f32 %v563_v20, 0.0  ;;  %v565_v26 = vmax.f32 %v561_v21, 0.0  ;;  %v568_v27 = vmax.f32 %v564_v22, 0.0  ;;  %v566_v28 = vmax.f32 %v562_v23, 0.0 }
 0x290   :  { %601 = vxpose.xlu2.b32.start [1/2] (short) (narrow) %v567_v25, 8  ;;  %v638_v29 = vrot.slane %v567_v25, 7  ;;  %v650_v30 = vrot.slane %v567_v25, 1  ;;  %569 = vxpose.xlu1.b32.start [1/2] (short) (narrow) %v565_v26, 8  ;;  %v636_v31 = vrot.slane %v565_v26, 7  ;;  %v648_v32 = vrot.slane %v565_v26, 1 }
 0x291   :  { %v639_v33 = vrot.slane %v568_v27, 7  ;;  %v651_v34 = vrot.slane %v568_v27, 1  ;;  %v637_v35 = vrot.slane %v566_v28, 7  ;;  %v649_v36 = vrot.slane %v566_v28, 1 }
 0x293   :  { %v640_v37 = vsel %vm107_vm3, %v638_v29, %v639_v33  ;;  %v643_v38 = vsel %vm107_vm3, %v639_v33, %v636_v31  ;;  %v655_v39 = vsel %vm124_vm4, %v651_v34, %v648_v32  ;;  %v641_v43 = vsel %vm107_vm3, %v637_v35, %v638_v29 }
 0x294   :  { %v644_v40 = vsel %vm99_vm2, 0.0, %v643_v38  ;;  %v659_v41 = vsel %vm102_vm5, 0.0, %v655_v39  ;;  %v663_v42 = vadd.f32 %v640_v37, %v568_v27  ;;  %v646_v45 = vsel %vm99_vm2, 0.0, %v641_v43 }
 0x295   :  { %v660_v44 = vadd.f32 %v644_v40, %v565_v26  ;;  %v653_v46 = vsel %vm124_vm4, %v649_v36, %v650_v30  ;;  %v642_v47 = vsel %vm107_vm3, %v636_v31, %v637_v35  ;;  %v662_v50 = vadd.f32 %v646_v45, %v567_v25 }
 0x296   :  { %v667_v48 = vadd.f32 %v663_v42, %v659_v41  ;;  %v657_v49 = vsel %vm102_vm5, 0.0, %v653_v46  ;;  %v654_v51 = vsel %vm124_vm4, %v648_v32, %v649_v36  ;;  %v652_v52 = vsel %vm124_vm4, %v650_v30, %v651_v34 }
 0x297   :  { %v661_v53 = vadd.f32 %v642_v47, %v566_v28  ;;  %v664_v54 = vadd.f32 %v660_v44, %v654_v51  ;;  %v666_v56 = vadd.f32 %v662_v50, %v652_v52 }
 0x298   :  { %602 = vxpose.xlu2.b32.end [2/2] (short) (narrow) %v568_v27, 8  ;;  %v671_v55 = vmul.f32 0.33333334, %v667_v48  ;;  %570 = vxpose.xlu1.b32.end [2/2] (short) (narrow) %v566_v28, 8 }
 0x299   :  { %v665_v57 = vadd.f32 %v661_v53, %v657_v49  ;;  %v668_v58 = vmul.f32 0.33333334, %v664_v54  ;;  %v670_v59 = vmul.f32 0.33333334, %v666_v56 }
 0x29a   :  { %675 = vst.msk [vmem:[#allocation2 + $0x18] sm:$0xff] %vm280_vm6, %v671_v55 }
 0x29b   :  { %v669_v24 = vmul.f32 0.33333334, %v665_v57  ;;  %672 = vst.msk [vmem:[#allocation2] sm:$0xff] %vm280_vm6, %v668_v58 }
 0x29c   :  { %674 = vst.msk [vmem:[#allocation2 + $0x10] sm:$0xff] %vm280_vm6, %v670_v59 }
 0x29d   :  { %673 = vst.msk [vmem:[#allocation2 + $0x8] sm:$0xff] %vm280_vm6, %v669_v24 }
 0x2a3   :  { %v678_v8 = vld [vmem:[#allocation2 + $0x10] ss:$2 sm:$0xff] }
 0x2a4   :  { %711 = vxpose.xlu2.b32.start.end [1/1] (short) (narrow) %v678_v8, 8  ;;  %v676_v60 = vld [vmem:[#allocation2] ss:$2 sm:$0xff] }
 0x2a5   :  { %679 = vxpose.xlu1.b32.start.end [1/1] (short) (narrow) %v676_v60, 8 }
 0x329   :  { %v617_v61 = vpop.trf.xlu2 }
 0x32a   :  { %635 = vst.msk [vmem:[#allocation5 + $0x8] sm:$0xff] %vm633_vm13, %v617_v61 }
 0x334   :  { %v585_v62 = vpop.trf.xlu1 }
 0x335   :  { %634 = vst.msk [vmem:[#allocation5] sm:$0xff] %vm633_vm13, %v585_v62 }
 0x336   :  { %770 = dma.vmem_to_hbm [thread:$0]  %s763_s6, 256, %s765_s26, [#allocation6], %s878_s27, %s878_s27, %s879_s28  }
 0x33d   :  { %v727_v63 = vpop.trf.xlu2 }
 0x33e   :  { %744 = vst.msk [vmem:[#allocation3 + $0x8] sm:$0xff] %vm280_vm6, %v727_v63 }
 0x349   :  { %v695_v0 = vpop.trf.xlu1 }
 0x34a   :  { %743 = vst.msk [vmem:[#allocation3] sm:$0xff] %vm280_vm6, %v695_v0 }
 0x34b   :  { %757 = dma.vmem_to_hbm [thread:$0]  %s750_s30, 256, %s752_s11, [#allocation4], %s878_s27, %s878_s27, %s879_s28  }
 0x34c   :  { %873 = dma.done.wait [#allocation4], 256  }
 0x34d   :  { %874 = vsyncadd [#allocation4], 4294967040 }
 0x34e   :  { %875 = dma.done.wait [#allocation6], 256  }
 0x34f   :  { %876 = vsyncadd [#allocation6], 4294967040 }
 0x350   :  { %779 = vsyncpa [#allocation4], 1 }
 0x351   :  { %780 = vsyncpa [#allocation6], 1 }

</bundles_post_ra>
